<compile_context>
chip_gen: v7x
topology: tpu7x:2x2x1
jax: 0.10.0
libtpu: 0.0.40
codegen_flags: <defaults>
</compile_context>

<pallas_src>
import jax
import jax.numpy as jnp
from jax.experimental import pallas as pl
from jax.experimental.pallas import tpu as pltpu


def _round_up(x, m):
    return (x + m - 1) // m * m


def _maxpool_kernel(x_ref, b_ref, o_ref):
    tc, _, w = x_ref.shape            # input block:  (tc, hb, W)
    _, rg, w_out = o_ref.shape        # output block: (tc, rg, W_out)

    xb = x_ref[...]                   # whole-block read, input dtype

    # Row-window max: output row g of this block uses input rows 3g, 3g+1, 3g+2
    # (static integer indexing into a loaded value -> plain VPU maxes; rg <= 16).
    rows = []
    for g in range(rg):
        r = jnp.maximum(jnp.maximum(xb[:, 3 * g, :], xb[:, 3 * g + 1, :]),
                        xb[:, 3 * g + 2, :])
        rows.append(r)
    rmax = jnp.stack(rows, axis=1)                                  # (tc, rg, W)

    # 3-wide column-window max via contiguous lane slices (VPU).
    cw = jnp.maximum(jnp.maximum(rmax[:, :, 0:w - 2], rmax[:, :, 1:w - 1]),
                     rmax[:, :, 2:w])                               # (tc, rg, W-2)

    # Stride-3 column selection: one exact 0/1 matmul on the MXU with all channels
    # and rows of this block batched into M = tc * rg.
    cw2 = cw.reshape(tc * rg, w - 2).astype(b_ref.dtype)
    pooled = jnp.dot(cw2, b_ref[...], preferred_element_type=jnp.float32)
    o_ref[...] = pooled.reshape(tc, rg, w_out).astype(o_ref.dtype)


def maxpool2d_3x3(x, *, vmem_budget_bytes=28 * 1024 * 1024, max_tc=256):
    """MaxPool2d(kernel_size=3) forward (stride=3, no padding, floor mode), NCHW."""
    n, c, h, w = x.shape
    assert h >= 3 and w >= 3, "MaxPool2d(kernel_size=3, ceil_mode=False) needs H, W >= 3"
    h_out = (h - 3) // 3 + 1          # floor mode: trailing rows/cols dropped
    w_out = (w - 3) // 3 + 1
    nc = n * c
    xf = x.reshape(nc, h, w)          # metadata-only reshape

    itemsize = jnp.dtype(x.dtype).itemsize
    sub = max(8, 32 // max(itemsize, 1))      # sublane tile: f32->8, bf16->16, int8->32

    # Row blocking: rg output rows (=> 3*rg input rows) per grid step; second-minor
    # block dims are either a multiple of the sublane tile or the full array dim.
    if h_out <= sub:
        rg, hb_in, nb_r = h_out, h, 1
    else:
        rg, hb_in = sub, 3 * sub
        nb_r = pl.cdiv(h_out, rg)

    # Exact 0/1 column-selection matrix: output column j picks window-max column 3j.
    # bf16 operands are exact (one 1.0 per column, f32 accumulation).
    b_dtype = x.dtype if x.dtype in (jnp.float32, jnp.bfloat16) else jnp.float32
    b_mat = (jnp.arange(w - 2)[:, None] == 3 * jnp.arange(w_out)[None, :]).astype(b_dtype)

    # Channel-block size from a padded-layout VMEM budget (double-buffered blocks).
    rw = _round_up(w, 128)
    rwo = _round_up(w_out, 128)
    b_bytes = 2 * _round_up(w - 2, sub) * rwo * jnp.dtype(b_dtype).itemsize
    per_chan = (2 * _round_up(hb_in, sub) * rw * itemsize     # input block  (x2 buffers)
                + 2 * _round_up(rg, sub) * rwo * itemsize     # output block (x2 buffers)
                + 3 * _round_up(rg, sub) * rw * 4)            # in-kernel temporaries
    tc = int(max(1, min(nc, max_tc, (vmem_budget_bytes - b_bytes) // max(per_chan, 1))))
    # Prefer an even channel split if a divisor of nc exists within 2x; otherwise the
    # ragged last block is handled by Pallas (no jnp.pad, no extra HBM pass).
    for d in range(tc, tc // 2, -1):
        if nc % d == 0:
            tc = d
            break
    nb_c = pl.cdiv(nc, tc)

    out = pl.pallas_call(
        _maxpool_kernel,
        grid=(nb_c, nb_r),
        in_specs=[
            pl.BlockSpec((tc, hb_in, w), lambda i, r: (i, r, 0)),
            pl.BlockSpec((w - 2, w_out), lambda i, r: (0, 0)),   # constant: DMA'd once
        ],
        out_specs=pl.BlockSpec((tc, rg, w_out), lambda i, r: (i, r, 0)),
        out_shape=jax.ShapeDtypeStruct((nc, h_out, w_out), x.dtype),
        compiler_params=pltpu.CompilerParams(
            dimension_semantics=("parallel", "parallel"),
            vmem_limit_bytes=48 * 1024 * 1024,
        ),
    )(xf, b_mat)

    return out.reshape(n, c, h_out, w_out)


if __name__ == "__main__":
    key = jax.random.PRNGKey(0)
    key1, key2 = jax.random.split(key)

    def _ref(x):
        return jax.lax.reduce_window(
            x, -jnp.inf, jax.lax.max,
            window_dimensions=(1, 1, 3, 3),
            window_strides=(1, 1, 3, 3),
            padding="VALID")

    # Primary case (small NCHW input consistent with the module).
    x = jax.random.normal(key1, (2, 4, 16, 16), dtype=jnp.float32)
    out = jax.block_until_ready(maxpool2d_3x3(x))
    ref = _ref(x)
    assert out.shape == ref.shape, (out.shape, ref.shape)
    assert jnp.allclose(out, ref), float(jnp.max(jnp.abs(out - ref)))

    # Exercise the multi-row-block path and ragged channel/row tiles.
    x2 = jax.random.normal(key2, (1, 5, 37, 40), dtype=jnp.float32)
    out2 = jax.block_until_ready(maxpool2d_3x3(x2, max_tc=2))
    ref2 = _ref(x2)
    assert out2.shape == ref2.shape, (out2.shape, ref2.shape)
    assert jnp.allclose(out2, ref2), float(jnp.max(jnp.abs(out2 - ref2)))

    print("KERNEL_OK")
</pallas_src>

<mosaic_0001>
module attributes {stable_mosaic.version = 11 : i64} {
  func.func @_maxpool_kernel(%arg0: i32, %arg1: i32, %arg2: memref<8x16x16xf32, #tpu.memory_space<vmem>>, %arg3: memref<14x5xf32, #tpu.memory_space<vmem>>, %arg4: memref<8x5x5xf32, #tpu.memory_space<vmem>>) attributes {dimension_semantics = [#tpu.dimension_semantics<parallel>, #tpu.dimension_semantics<parallel>], iteration_bounds = array<i64: 1, 1>, scalar_prefetch = 0 : i64, scratch_operands = 0 : i64, tpu.core_type = #tpu.core_type<tc>, window_params = [{transform_indices = @transform_0, window_bounds = array<i64: 8, 16, 16>}, {pipeline_mode = #tpu.pipeline_mode<synchronous>, transform_indices = @transform_1, window_bounds = array<i64: 14, 5>}, {transform_indices = @transform_2, window_bounds = array<i64: 8, 5, 5>}]} {
    %c0 = arith.constant 0 : index
    %c0_0 = arith.constant 0 : index
    %c0_1 = arith.constant 0 : index
    %0 = vector.load %arg2[%c0, %c0_0, %c0_1] : memref<8x16x16xf32, #tpu.memory_space<vmem>>, vector<8x16x16xf32>
    %1 = vector.extract_strided_slice %0 {offsets = [0, 0, 0], sizes = [8, 1, 16], strides = [1, 1, 1]} : vector<8x16x16xf32> to vector<8x1x16xf32>
    %2 = vector.shape_cast %1 : vector<8x1x16xf32> to vector<8x16xf32>
    %3 = vector.extract_strided_slice %0 {offsets = [0, 1, 0], sizes = [8, 1, 16], strides = [1, 1, 1]} : vector<8x16x16xf32> to vector<8x1x16xf32>
    %4 = vector.shape_cast %3 : vector<8x1x16xf32> to vector<8x16xf32>
    %5 = arith.maximumf %2, %4 : vector<8x16xf32>
    %6 = vector.extract_strided_slice %0 {offsets = [0, 2, 0], sizes = [8, 1, 16], strides = [1, 1, 1]} : vector<8x16x16xf32> to vector<8x1x16xf32>
    %7 = vector.shape_cast %6 : vector<8x1x16xf32> to vector<8x16xf32>
    %8 = arith.maximumf %5, %7 : vector<8x16xf32>
    %9 = vector.extract_strided_slice %0 {offsets = [0, 3, 0], sizes = [8, 1, 16], strides = [1, 1, 1]} : vector<8x16x16xf32> to vector<8x1x16xf32>
    %10 = vector.shape_cast %9 : vector<8x1x16xf32> to vector<8x16xf32>
    %11 = vector.extract_strided_slice %0 {offsets = [0, 4, 0], sizes = [8, 1, 16], strides = [1, 1, 1]} : vector<8x16x16xf32> to vector<8x1x16xf32>
    %12 = vector.shape_cast %11 : vector<8x1x16xf32> to vector<8x16xf32>
    %13 = arith.maximumf %10, %12 : vector<8x16xf32>
    %14 = vector.extract_strided_slice %0 {offsets = [0, 5, 0], sizes = [8, 1, 16], strides = [1, 1, 1]} : vector<8x16x16xf32> to vector<8x1x16xf32>
    %15 = vector.shape_cast %14 : vector<8x1x16xf32> to vector<8x16xf32>
    %16 = arith.maximumf %13, %15 : vector<8x16xf32>
    %17 = vector.extract_strided_slice %0 {offsets = [0, 6, 0], sizes = [8, 1, 16], strides = [1, 1, 1]} : vector<8x16x16xf32> to vector<8x1x16xf32>
    %18 = vector.shape_cast %17 : vector<8x1x16xf32> to vector<8x16xf32>
    %19 = vector.extract_strided_slice %0 {offsets = [0, 7, 0], sizes = [8, 1, 16], strides = [1, 1, 1]} : vector<8x16x16xf32> to vector<8x1x16xf32>
    %20 = vector.shape_cast %19 : vector<8x1x16xf32> to vector<8x16xf32>
    %21 = arith.maximumf %18, %20 : vector<8x16xf32>
    %22 = vector.extract_strided_slice %0 {offsets = [0, 8, 0], sizes = [8, 1, 16], strides = [1, 1, 1]} : vector<8x16x16xf32> to vector<8x1x16xf32>
    %23 = vector.shape_cast %22 : vector<8x1x16xf32> to vector<8x16xf32>
    %24 = arith.maximumf %21, %23 : vector<8x16xf32>
    %25 = vector.extract_strided_slice %0 {offsets = [0, 9, 0], sizes = [8, 1, 16], strides = [1, 1, 1]} : vector<8x16x16xf32> to vector<8x1x16xf32>
    %26 = vector.shape_cast %25 : vector<8x1x16xf32> to vector<8x16xf32>
    %27 = vector.extract_strided_slice %0 {offsets = [0, 10, 0], sizes = [8, 1, 16], strides = [1, 1, 1]} : vector<8x16x16xf32> to vector<8x1x16xf32>
    %28 = vector.shape_cast %27 : vector<8x1x16xf32> to vector<8x16xf32>
    %29 = arith.maximumf %26, %28 : vector<8x16xf32>
    %30 = vector.extract_strided_slice %0 {offsets = [0, 11, 0], sizes = [8, 1, 16], strides = [1, 1, 1]} : vector<8x16x16xf32> to vector<8x1x16xf32>
    %31 = vector.shape_cast %30 : vector<8x1x16xf32> to vector<8x16xf32>
    %32 = arith.maximumf %29, %31 : vector<8x16xf32>
    %33 = vector.extract_strided_slice %0 {offsets = [0, 12, 0], sizes = [8, 1, 16], strides = [1, 1, 1]} : vector<8x16x16xf32> to vector<8x1x16xf32>
    %34 = vector.shape_cast %33 : vector<8x1x16xf32> to vector<8x16xf32>
    %35 = vector.extract_strided_slice %0 {offsets = [0, 13, 0], sizes = [8, 1, 16], strides = [1, 1, 1]} : vector<8x16x16xf32> to vector<8x1x16xf32>
    %36 = vector.shape_cast %35 : vector<8x1x16xf32> to vector<8x16xf32>
    %37 = arith.maximumf %34, %36 : vector<8x16xf32>
    %38 = vector.extract_strided_slice %0 {offsets = [0, 14, 0], sizes = [8, 1, 16], strides = [1, 1, 1]} : vector<8x16x16xf32> to vector<8x1x16xf32>
    %39 = vector.shape_cast %38 : vector<8x1x16xf32> to vector<8x16xf32>
    %40 = arith.maximumf %37, %39 : vector<8x16xf32>
    %41 = vector.shape_cast %8 : vector<8x16xf32> to vector<8x1x16xf32>
    %42 = vector.shape_cast %16 : vector<8x16xf32> to vector<8x1x16xf32>
    %43 = vector.shape_cast %24 : vector<8x16xf32> to vector<8x1x16xf32>
    %44 = vector.shape_cast %32 : vector<8x16xf32> to vector<8x1x16xf32>
    %45 = vector.shape_cast %40 : vector<8x16xf32> to vector<8x1x16xf32>
    %46 = tpu.concatenate %41, %42, %43, %44, %45 in 1 : vector<8x1x16xf32>, vector<8x1x16xf32>, vector<8x1x16xf32>, vector<8x1x16xf32>, vector<8x1x16xf32> -> vector<8x5x16xf32>
    %47 = vector.extract_strided_slice %46 {offsets = [0, 0, 0], sizes = [8, 5, 14], strides = [1, 1, 1]} : vector<8x5x16xf32> to vector<8x5x14xf32>
    %48 = vector.extract_strided_slice %46 {offsets = [0, 0, 1], sizes = [8, 5, 14], strides = [1, 1, 1]} : vector<8x5x16xf32> to vector<8x5x14xf32>
    %49 = arith.maximumf %47, %48 : vector<8x5x14xf32>
    %50 = vector.extract_strided_slice %46 {offsets = [0, 0, 2], sizes = [8, 5, 14], strides = [1, 1, 1]} : vector<8x5x16xf32> to vector<8x5x14xf32>
    %51 = arith.maximumf %49, %50 : vector<8x5x14xf32>
    %52 = vector.shape_cast %51 : vector<8x5x14xf32> to vector<40x14xf32>
    %c0_2 = arith.constant 0 : index
    %c0_3 = arith.constant 0 : index
    %53 = vector.load %arg3[%c0_2, %c0_3] : memref<14x5xf32, #tpu.memory_space<vmem>>, vector<14x5xf32>
    %cst = arith.constant dense<0.000000e+00> : vector<40x5xf32>
    %54 = tpu.matmul %52, %53, %cst {dimension_numbers = #tpu.dot_dimension_numbers<[1], [0], [0], [1], [0, 0, 1, 1], [], []>} : vector<40x14xf32>, vector<14x5xf32>, vector<40x5xf32> -> vector<40x5xf32>
    %55 = vector.shape_cast %54 : vector<40x5xf32> to vector<8x5x5xf32>
    %c0_4 = arith.constant 0 : index
    %c0_5 = arith.constant 0 : index
    %c0_6 = arith.constant 0 : index
    %56 = vector.load %arg4[%c0_4, %c0_5, %c0_6] : memref<8x5x5xf32, #tpu.memory_space<vmem>>, vector<8x5x5xf32>
    tpu.vector_store %arg4[%c0_4, %c0_5, %c0_6], %55 {strides = array<i32>} : memref<8x5x5xf32, #tpu.memory_space<vmem>>, vector<8x5x5xf32>,
    return
  }
  func.func @transform_0(%arg0: i32, %arg1: i32) -> (i32, i32, i32) {
    %c0_i32 = arith.constant 0 : i32
    %c0_i32_0 = arith.constant 0 : i32
    return %arg0, %arg1, %c0_i32 : i32, i32, i32
  }
  func.func @transform_1(%arg0: i32, %arg1: i32) -> (i32, i32) {
    %c0_i32 = arith.constant 0 : i32
    %c0_i32_0 = arith.constant 0 : i32
    %c0_i32_1 = arith.constant 0 : i32
    return %c0_i32, %c0_i32_0 : i32, i32
  }
  func.func @transform_2(%arg0: i32, %arg1: i32) -> (i32, i32, i32) {
    %c0_i32 = arith.constant 0 : i32
    %c0_i32_0 = arith.constant 0 : i32
    return %arg0, %arg1, %c0_i32 : i32, i32, i32
  }
}

</mosaic_0001>

<bundles_post_ra>
// kernel: tpu_custom_call.1
= control target key start
LH: loop header
LB: loop body
LE: loop exit
PB: predicated region body
PF: predicated region fallthrough
CT: control target
= control target key end

     0   :  { %7 = vsyncpa [#allocation3], 0  ;;  %s1677_s9 = smov [#allocation2]   ;;  %s2031_s0 = inlined_call_operand.hbm [shape: f32[8,16,16], index: 0, kind: input, shape index: {}]   ;;  %s2032_s1 = inlined_call_operand.vmem [shape: f32[14,5], index: 1, kind: input, shape index: {}]   ;;  %s2033_s2 = inlined_call_operand.vmem [shape: f32[8,5,5], index: 2, kind: output, shape index: {}]  }
   0x1   :  { %s13_s10 = sshll.u32 %s1677_s9, 4  ;;  %s1653_s13 = scalar_lea.hbm %s2031_s0, 2048  ;;  %s14_s10 = int_to_ptr.vmem [resolvable:$true] %s13_s10 }
   0x2   :  { %p1654_p0 = scmp.ne.s32.totalorder %s2031_s0, %s1653_s13  ;;  %p1657_p1 = scmp.lt.u32.totalorder %s1653_s13, %s2031_s0 }
   0x4   :  { %p1659_p2 = pnand %p1657_p1, %p1654_p0 }
   0x6   :  { %1662 = shalt.err (!%p1659_p2)
}
   0x7   :  { %s1663_s18 = scalar_lea.vmem %s14_s10, 2048  ;;  %p1668_p4 = scmp.lt.s32.totalorder %s14_s10, %s14_s10 }
   0x8   :  { %p1664_p3 = scmp.ne.s32.totalorder %s14_s10, %s1663_s18  ;;  %p1669_p5 = scmp.lt.s32.totalorder %s1663_s18, %s1663_s18 }
   0xa   :  { %p1670_p6 = por %p1669_p5, %p1668_p4 }
   0xc   :  { %p1671_p7 = pnand %p1670_p6, %p1664_p3 }
   0xe   :  { %1674 = shalt.err (!%p1671_p7)
}
   0xf   :  { %s1678_s19 = smov 128   ;;  %s1679_s20 = smov 8  }
  0x10   :  { %19 = dma.hbm_to_vmem [thread:$0]  %s2031_s0, 2048, %s14_s10, [#allocation3], %s1678_s19, %s1678_s19, %s1679_s20  }
  0x11   :  { %1675 = dma.done.wait [#allocation3], 2048  }
  0x12   :  { %1676 = vsyncadd [#allocation3], 4294965248  ;;  %v35_v0 = vld [vmem:[#allocation2 + $0x50] sm:$0xff]  ;;  %v36_v1 = vld [vmem:[#allocation2 + $0x58] sm:$0xff]  ;;  %vm233_vm0 = vcmask 1040384   ;;  %vm242_vm1 = vcmask 1041408  }
  0x13   :  { %vm251_vm2 = vcmask 1042432   ;;  %v25_v2 = vld [vmem:[#allocation2] sm:$0xff]  ;;  %v54_v3 = vrot.slane %v35_v0, 1  ;;  %v78_v4 = vrot.slane %v35_v0, 2  ;;  %v110_v5 = vrot.slane %v36_v1, 2  ;;  %v26_v7 = vld [vmem:[#allocation2 + $0x8] sm:$0xff] }
  0x14   :  { %v134_v6 = vrot.slane %v36_v1, 1  ;;  %vm260_vm3 = vcmask 1043456   ;;  %v27_v8 = vld [vmem:[#allocation2 + $0x10] sm:$0xff]  ;;  %v49_v9 = vrot.slane %v25_v2, 1  ;;  %v73_v10 = vrot.slane %v25_v2, 2  ;;  %v28_v13 = vld [vmem:[#allocation2 + $0x18] sm:$0xff] }
  0x15   :  { %v105_v11 = vrot.slane %v26_v7, 2  ;;  %v129_v12 = vrot.slane %v26_v7, 1  ;;  %v70_v14 = vmax.f32 %v35_v0, %v54_v3  ;;  %v50_v16 = vrot.slane %v27_v8, 1  ;;  %v29_v30 = vld [vmem:[#allocation2 + $0x20] sm:$0xff]  ;;  %v30_v46 = vld [vmem:[#allocation2 + $0x28] sm:$0xff]  ;;  %s1680_s0 = smov 127  }
  0x16   :  { %v150_v15 = vmax.f32 %v36_v1, %v134_v6  ;;  %v74_v17 = vrot.slane %v27_v8, 2  ;;  %v65_v18 = vmax.f32 %v25_v2, %v49_v9  ;;  %v106_v20 = vrot.slane %v28_v13, 2  ;;  %v37_v52 = vld [vmem:[#allocation2 + $0x60] sm:$0xff]  ;;  %v38_v57 = vld [vmem:[#allocation2 + $0x68] sm:$0xff]  ;;  %s1681_s23 = smov 126  }
  0x17   :  { %v145_v19 = vmax.f32 %v26_v7, %v129_v12  ;;  %v130_v21 = vrot.slane %v28_v13, 1  ;;  %v94_v22 = vmax.f32 %v70_v14, %v78_v4  ;;  %v126_v23 = vmax.f32 %v70_v14, %v110_v5  ;;  %v33_v62 = vld [vmem:[#allocation2 + $0x40] sm:$0xff]  ;;  %v34_v3 = vld [vmem:[#allocation2 + $0x48] sm:$0xff] }
  0x18   :  { %v158_v24 = vmax.f32 %v150_v15, %v110_v5  ;;  %v66_v25 = vmax.f32 %v27_v8, %v50_v16  ;;  %v89_v26 = vmax.f32 %v65_v18, %v73_v10  ;;  %v121_v27 = vmax.f32 %v65_v18, %v105_v11 }
  0x19   :  { %v153_v28 = vmax.f32 %v145_v19, %v105_v11  ;;  %v146_v29 = vmax.f32 %v28_v13, %v130_v21  ;;  %v174_v31 = vrot.slane %v94_v22, 2  ;;  %v198_v32 = vrot.slane %v126_v23, 4 }
  0x1a   :  { %v222_v33 = vrot.slane %v158_v24, 6  ;;  %v90_v34 = vmax.f32 %v66_v25, %v74_v17  ;;  %v169_v35 = vrot.slane %v89_v26, 2  ;;  %v193_v36 = vrot.slane %v121_v27, 4 }
  0x1b   :  { %v217_v37 = vrot.slane %v153_v28, 6  ;;  %v122_v38 = vmax.f32 %v66_v25, %v106_v20  ;;  %v239_v39 = vsel %vm233_vm0, %v94_v22, %v174_v31  ;;  %v154_v40 = vmax.f32 %v146_v29, %v106_v20  ;;  %v31_v20 = vld [vmem:[#allocation2 + $0x30] sm:$0xff] }
  0x1c   :  { %v170_v41 = vrot.slane %v90_v34, 2  ;;  %v51_v42 = vrot.slane %v29_v30, 1  ;;  %v248_v43 = vsel %vm242_vm1, %v239_v39, %v198_v32  ;;  %v234_v44 = vsel %vm233_vm0, %v89_v26, %v169_v35  ;;  %v32_v32 = vld [vmem:[#allocation2 + $0x38] sm:$0xff] }
  0x1d   :  { %v194_v45 = vrot.slane %v122_v38, 4  ;;  %v75_v47 = vrot.slane %v29_v30, 2  ;;  %v257_v48 = vsel %vm251_vm2, %v248_v43, %v222_v33  ;;  %v243_v49 = vsel %vm242_vm1, %v234_v44, %v193_v36 }
  0x1e   :  { %v218_v50 = vrot.slane %v154_v40, 6  ;;  %v235_v51 = vsel %vm233_vm0, %v90_v34, %v170_v41  ;;  %v1721_v53 = vsel %vm260_vm3, %v257_v48, %v158_v24  ;;  %v252_v54 = vsel %vm251_vm2, %v243_v49, %v217_v37 }
  0x1f   :  { %v244_v55 = vsel %vm242_vm1, %v235_v51, %v194_v45  ;;  %v67_v56 = vmax.f32 %v29_v30, %v51_v42  ;;  %287 = vrot.lane.b32.xlu1 %v1721_v53, %s1680_s0  ;;  %v1728_v58 = vsel %vm260_vm3, %v252_v54, %v153_v28  ;;  %v107_v60 = vrot.slane %v30_v46, 2  ;;  %v39_v42 = vld [vmem:[#allocation2 + $0x70] sm:$0xff] }
  0x20   :  { %v253_v59 = vsel %vm251_vm2, %v244_v55, %v218_v50  ;;  %v131_v61 = vrot.slane %v30_v46, 1  ;;  %277 = vrot.lane.b32.xlu0 %v1728_v58, %s1680_s0  ;;  %v55_v1 = vrot.slane %v37_v52, 1  ;;  %v79_v2 = vrot.slane %v37_v52, 2 }
  0x21   :  { %v1734_v63 = vsel %vm260_vm3, %v253_v59, %v154_v40  ;;  %v91_v0 = vmax.f32 %v67_v56, %v75_v47  ;;  %v123_v4 = vmax.f32 %v67_v56, %v107_v60  ;;  %v111_v6 = vrot.slane %v38_v57, 2  ;;  %v40_v47 = vld [vmem:[#allocation2 + $0x78] sm:$0xff] }
  0x22   :  { %v147_v5 = vmax.f32 %v30_v46, %v131_v61  ;;  %v135_v7 = vrot.slane %v38_v57, 1  ;;  %v71_v9 = vmax.f32 %v37_v52, %v55_v1  ;;  %v53_v10 = vrot.slane %v33_v62, 1 }
  0x23   :  { %v171_v8 = vrot.slane %v91_v0, 2  ;;  %v77_v11 = vrot.slane %v33_v62, 2  ;;  %309 = vrot.lane.b32.xlu1 %v1728_v58, %s1681_s23  ;;  %v195_v13 = vrot.slane %v123_v4, 4  ;;  %v109_v15 = vrot.slane %v34_v3, 2 }
  0x24   :  { %v155_v12 = vmax.f32 %v147_v5, %v107_v60  ;;  %v151_v14 = vmax.f32 %v38_v57, %v135_v7  ;;  %279 = vrot.lane.b32.xlu0 %v1734_v63, %s1680_s0  ;;  %v95_v17 = vmax.f32 %v71_v9, %v79_v2  ;;  %v127_v18 = vmax.f32 %v71_v9, %v111_v6  ;;  %v661_v9 = vld [vmem:[%s2032_s1] sm:$0xff] }
  0x25   :  { %v236_v16 = vsel %vm233_vm0, %v91_v0, %v171_v8  ;;  %v69_v19 = vmax.f32 %v33_v62, %v53_v10  ;;  %v133_v24 = vrot.slane %v34_v3, 1  ;;  %v52_v33 = vrot.slane %v31_v20, 1  ;;  %v662_v10 = vld [vmem:[%s2032_s1 + $0x8] sm:$0x3f] }
  0x26   :  { %v219_v21 = vrot.slane %v155_v12, 6  ;;  %v245_v22 = vsel %vm242_vm1, %v236_v16, %v195_v13  ;;  %v159_v23 = vmax.f32 %v151_v14, %v111_v6  ;;  %v175_v25 = vrot.slane %v95_v17, 2 }
  0x27   :  { %v199_v26 = vrot.slane %v127_v18, 4  ;;  %v93_v27 = vmax.f32 %v69_v19, %v77_v11  ;;  %v125_v28 = vmax.f32 %v69_v19, %v109_v15  ;;  %v149_v31 = vmax.f32 %v34_v3, %v133_v24 }
  0x28   :  { %v254_v29 = vsel %vm251_vm2, %v245_v22, %v219_v21  ;;  %v223_v30 = vrot.slane %v159_v23, 6  ;;  %311 = vrot.lane.b32.xlu0 %v1734_v63, %s1681_s23  ;;  %v240_v35 = vsel %vm233_vm0, %v95_v17, %v175_v25  ;;  %v68_v40 = vmax.f32 %v31_v20, %v52_v33 }
  0x29   :  { %v1744_v34 = vsel %vm260_vm3, %v254_v29, %v155_v12  ;;  %v173_v36 = vrot.slane %v93_v27, 2  ;;  %v197_v37 = vrot.slane %v125_v28, 4  ;;  %v249_v38 = vsel %vm242_vm1, %v240_v35, %v199_v26 }
  0x2a   :  { %281 = vrot.lane.b32.xlu1 %v1744_v34, %s1680_s0  ;;  %v157_v39 = vmax.f32 %v149_v31, %v109_v15  ;;  %v76_v41 = vrot.slane %v31_v20, 2  ;;  %v258_v43 = vsel %vm251_vm2, %v249_v38, %v223_v30  ;;  %v108_v45 = vrot.slane %v32_v32, 2 }
  0x2b   :  { %v238_v44 = vsel %vm233_vm0, %v93_v27, %v173_v36  ;;  %v132_v46 = vrot.slane %v32_v32, 1  ;;  %v1755_v48 = vsel %vm260_vm3, %v258_v43, %v159_v23  ;;  %v56_v55 = vrot.slane %v39_v42, 1 }
  0x2c   :  { %v221_v49 = vrot.slane %v157_v39, 6  ;;  %v247_v50 = vsel %vm242_vm1, %v238_v44, %v197_v37  ;;  %v92_v51 = vmax.f32 %v68_v40, %v76_v41  ;;  %v124_v52 = vmax.f32 %v68_v40, %v108_v45 }
  0x2d   :  { %v148_v54 = vmax.f32 %v32_v32, %v132_v46  ;;  %v80_v56 = vrot.slane %v39_v42, 2  ;;  %v112_v60 = vrot.slane %v40_v47, 2  ;;  %v136_v61 = vrot.slane %v40_v47, 1 }
  0x2e   :  { %289 = vrot.lane.b32.xlu1 %v1755_v48, %s1680_s0  ;;  %v256_v57 = vsel %vm251_vm2, %v247_v50, %v221_v49  ;;  %v172_v59 = vrot.slane %v92_v51, 2  ;;  %v196_v1 = vrot.slane %v124_v52, 4  ;;  %v72_v2 = vmax.f32 %v39_v42, %v56_v55 }
  0x2f   :  { %v1762_v62 = vsel %vm260_vm3, %v256_v57, %v157_v39  ;;  %v156_v0 = vmax.f32 %v148_v54, %v108_v45  ;;  %v152_v4 = vmax.f32 %v40_v47, %v136_v61  ;;  %v1682_v15 = vmov 0.0|0.0  }
  0x30   :  { %285 = vrot.lane.b32.xlu0 %v1762_v62, %s1680_s0  ;;  %v237_v3 = vsel %vm233_vm0, %v92_v51, %v172_v59  ;;  %v96_v7 = vmax.f32 %v72_v2, %v80_v56  ;;  %v128_v8 = vmax.f32 %v72_v2, %v112_v60  ;;  %1637 = vmatprep.subr.bf16.mxu0 %v1682_v15  ;;  %vm919_vm4 = vcmask 1045504  }
  0x31   :  { %v220_v5 = vrot.slane %v156_v0, 6  ;;  %v246_v6 = vsel %vm242_vm1, %v237_v3, %v196_v1  ;;  %v160_v11 = vmax.f32 %v152_v4, %v112_v60  ;;  %1641 = vmatprep.subr.bf16.mxu1 %v1682_v15  ;;  %v1638_v18 = vpack.c.bf16 %v662_v10, %v661_v9 }
  0x32   :  { %v176_v13 = vrot.slane %v96_v7, 2  ;;  %v200_v14 = vrot.slane %v128_v8, 4  ;;  %vm1683_vm5 = vmmov 1   ;;  %vm1684_vm7 = vmmov 0  }
  0x33   :  { %v255_v12 = vsel %vm251_vm2, %v246_v6, %v220_v5  ;;  %v224_v17 = vrot.slane %v160_v11, 6  ;;  %vm1639_vm6 = vmpackc.low %vm919_vm4, %vm1683_vm5  ;;  %v1685_v21 = vmov 0.0   ;;  %v1686_v24 = vmov 1966171168  }
  0x34   :  { %v1776_v16 = vsel %vm260_vm3, %v255_v12, %v156_v0  ;;  %319 = vrot.lane.b32.xlu0 %v1721_v53, %s1681_s23  ;;  %v241_v19 = vsel %vm233_vm0, %v96_v7, %v176_v13  ;;  %1622 = vmatprep.mubr.msk.f32.mxu0 %vm1684_vm7, %v1685_v21  ;;  %v351_v25 = vunpack.c.l.s4 %v1686_v24  ;;  %v353_v26 = vlaneseq }
  0x35   :  { %283 = vrot.lane.b32.xlu1 %v1776_v16, %s1680_s0  ;;  %v250_v20 = vsel %vm242_vm1, %v241_v19, %v200_v14  ;;  %1631 = vmatprep.mubr.msk.f32.mxu1 %vm1684_vm7, %v1685_v21  ;;  %vm908_vm8 = vcmask 113664   ;;  %vm1583_vm9 = vcmask 36864  }
  0x36   :  { %v259_v22 = vsel %vm251_vm2, %v250_v20, %v224_v17  ;;  %1640 = vmatpush3.bf16.msk.msra.mxu0 %vm1639_vm6, %v1638_v18  ;;  %1642 = vmatpush3.bf16.msk.msra.mxu1 %vm1639_vm6, %v1638_v18  ;;  %v352_v27 = vunpack.c.0.s8 %v351_v25  ;;  %v354_v28 = vshrl.u32 %v353_v26, 7 }
  0x37   :  { %v1790_v23 = vsel %vm260_vm3, %v259_v22, %v160_v11 }
  0x38   :  { %291 = vrot.lane.b32.xlu0 %v1790_v23, %s1680_s0  ;;  %v1805_v32 = vsub.s32 %v352_v27, %v354_v28 }
  0x39   :  { %313 = vrot.lane.b32.xlu1 %v1744_v34, %s1681_s23 }
  0x3c   :  { %317 = vrot.lane.b32.xlu0 %v1762_v62, %s1681_s23 }
  0x3d   :  { %321 = vrot.lane.b32.xlu1 %v1755_v48, %s1681_s23 }
  0x40   :  { %315 = vrot.lane.b32.xlu0 %v1776_v16, %s1681_s23 }
  0x41   :  { %323 = vrot.lane.b32.xlu1 %v1790_v23, %s1681_s23 }
  0x91   :  { %v288_v29 = vpop.permute.xlu1 %287 }
  0x92   :  { %v278_v30 = vpop.permute.xlu0 %277  ;;  %v306_v0 = vmax.f32 %v1721_v53, %v288_v29 }
  0x93   :  { %v301_v31 = vmax.f32 %v1728_v58, %v278_v30 }
  0x95   :  { %v310_v33 = vpop.permute.xlu1 %309 }
  0x96   :  { %v333_v35 = vmax.f32 %v301_v31, %v310_v33  ;;  %v280_v36 = vpop.permute.xlu0 %279 }
  0x97   :  { %v302_v39 = vmax.f32 %v1734_v63, %v280_v36 }
  0x98   :  { %v349_v37 = vcombine.high %v333_v35, %v333_v35  ;;  %v356_v38 = vrot.slane %v333_v35, %v1805_v32 }
  0x9a   :  { %v364_v40 = vcombine.high %v356_v38, %v356_v38  ;;  %v312_v41 = vpop.permute.xlu0 %311  ;;  %v363_v42 = vrot.slane %v349_v37, %v1805_v32  ;;  %v371_v45 = vrot.slane %v356_v38, %v1805_v32 }
  0x9b   :  { %v334_v44 = vmax.f32 %v302_v39, %v312_v41 }
  0x9c   :  { %v282_v43 = vpop.permute.xlu1 %281  ;;  %v385_v58 = vrot.slane %v364_v40, %v1805_v32  ;;  %v378_v50 = vrot.slane %v363_v42, %v1805_v32 }
  0x9d   :  { %v395_v46 = vrot.slane %v334_v44, %v1805_v32  ;;  %v388_v1 = vcombine.high %v334_v44, %v334_v44  ;;  %v303_v11 = vmax.f32 %v1744_v34, %v282_v43 }
  0x9e   :  { %v663_v47 = vcombine.low %v371_v45, %v385_v58  ;;  %v1597_v49 = vcombine.high %v371_v45, %v385_v58 }
  0x9f   :  { %v403_v51 = vcombine.high %v395_v46, %v395_v46  ;;  %v410_v52 = vrot.slane %v395_v46, %v1805_v32  ;;  %v402_v9 = vrot.slane %v388_v1, %v1805_v32 }
  0xa0   :  { %v673_v63 = vrot.slane %v663_v47, %v1805_v32  ;;  %v290_v54 = vpop.permute.xlu1 %289  ;;  %v680_v55 = vrot.slane %v1597_v49, %v1805_v32 }
  0xa1   :  { %v424_v56 = vrot.slane %v403_v51, %v1805_v32  ;;  %v425_v57 = vcombine.high %v410_v52, %v410_v52  ;;  %v665_v59 = vcombine.low %v378_v50, %v410_v52  ;;  %v417_v24 = vrot.slane %v402_v9, %v1805_v32 }
  0xa2   :  { %v286_v60 = vpop.permute.xlu0 %285  ;;  %v695_v2 = vcombine.low %v673_v63, %v680_v55  ;;  %v307_v34 = vmax.f32 %v1755_v48, %v290_v54 }
  0xa3   :  { %v666_v61 = vcombine.low %v424_v56, %v425_v57  ;;  %v687_v3 = vrot.slane %v665_v59, %v1805_v32  ;;  %v426_v14 = vcombine.high %v424_v56, %v424_v56  ;;  %v305_v30 = vmax.f32 %v1762_v62, %v286_v60 }
  0xa4   :  { %v703_v13 = vrot.slane %v695_v2, %v1805_v32 }
  0xa5   :  { %v694_v4 = vrot.slane %v666_v61, %v1805_v32  ;;  %v1833_v29 = vcombine.low %v426_v14, %v417_v24 }
  0xa6   :  { %v320_v5 = vpop.permute.xlu0 %319 }
  0xa7   :  { %v284_v6 = vpop.permute.xlu1 %283  ;;  %v338_v7 = vmax.f32 %v306_v0, %v320_v5  ;;  %v696_v8 = vcombine.low %v687_v3, %v694_v4  ;;  %v722_v62 = vrot.slane %v1833_v29, %v1805_v32 }
  0xa8   :  { %v304_v44 = vmax.f32 %v1776_v16, %v284_v6 }
  0xa9   :  { %v551_v10 = vrot.slane %v338_v7, %v1805_v32  ;;  %v544_v12 = vcombine.high %v338_v7, %v338_v7  ;;  %v710_v53 = vrot.slane %v696_v8, %v1805_v32 }
  0xaa   :  { %v292_v19 = vpop.permute.xlu0 %291 }
  0xab   :  { %v559_v15 = vcombine.high %v551_v10, %v551_v10  ;;  %v566_v17 = vrot.slane %v551_v10, %v1805_v32  ;;  %v314_v18 = vpop.permute.xlu1 %313  ;;  %v711_v22 = vcombine.low %v703_v13, %v710_v53  ;;  %v558_v27 = vrot.slane %v544_v12, %v1805_v32 }
  0xac   :  { %v335_v20 = vmax.f32 %v303_v11, %v314_v18  ;;  %v308_v54 = vmax.f32 %v1790_v23, %v292_v19 }
  0xad   :  { %v580_v25 = vrot.slane %v559_v15, %v1805_v32  ;;  %v581_v26 = vcombine.high %v566_v17, %v566_v17  ;;  %1623 = vmatmul.mubr.msk.f32.vlgmr.msra.gmra.mrb[0].mxu0 %vm908_vm8, %v711_v22  ;;  %v573_v40 = vrot.slane %v558_v27, %v1805_v32 }
  0xae   :  { %v434_v28 = vrot.slane %v335_v20, %v1805_v32  ;;  %v318_v33 = vpop.permute.xlu0 %317  ;;  %1625 = vmatprep.mubr.msk.f32.mxu0 %vm1684_vm7, %v1685_v21  ;;  %v427_v36 = vcombine.high %v335_v20, %v335_v20 }
  0xaf   :  { %v322_v31 = vpop.permute.xlu1 %321  ;;  %v582_v35 = vcombine.high %v580_v25, %v580_v25  ;;  %v811_v48 = vcombine.low %v580_v25, %v581_v26  ;;  %v337_v39 = vmax.f32 %v305_v30, %v318_v33 }
  0xb0   :  { %v442_v37 = vcombine.high %v434_v28, %v434_v28  ;;  %v339_v38 = vmax.f32 %v307_v34, %v322_v31  ;;  %v441_v47 = vrot.slane %v427_v36, %v1805_v32  ;;  %v449_v49 = vrot.slane %v434_v28, %v1805_v32 }
  0xb1   :  { %v505_v45 = vcombine.high %v337_v39, %v337_v39  ;;  %v512_v58 = vrot.slane %v337_v39, %v1805_v32  ;;  %v812_v46 = vcombine.low %v582_v35, %v573_v40  ;;  %v827_v63 = vrot.slane %v811_v48, %v1805_v32 }
  0xb2   :  { %v1840_v41 = vrot.slane %v442_v37, %v1805_v32  ;;  %v583_v42 = vcombine.high %v339_v38, %v339_v38  ;;  %v590_v43 = vrot.slane %v339_v38, %v1805_v32  ;;  %v316_v52 = vpop.permute.xlu0 %315  ;;  %v456_v23 = vrot.slane %v441_v47, %v1805_v32 }
  0xb3   :  { %v324_v51 = vpop.permute.xlu1 %323  ;;  %v519_v55 = vrot.slane %v505_v45, %v1805_v32  ;;  %v520_v56 = vcombine.high %v512_v58, %v512_v58  ;;  %v336_v2 = vmax.f32 %v304_v44, %v316_v52  ;;  %v834_v3 = vrot.slane %v812_v46, %v1805_v32 }
  0xb4   :  { %v598_v50 = vcombine.high %v590_v43, %v590_v43  ;;  %v713_v16 = vcombine.low %v449_v49, %v1840_v41  ;;  %v597_v57 = vrot.slane %v583_v42, %v1805_v32  ;;  %v605_v59 = vrot.slane %v590_v43, %v1805_v32 }
  0xb5   :  { %v534_v61 = vrot.slane %v519_v55, %v1805_v32  ;;  %v541_v0 = vrot.slane %v520_v56, %v1805_v32  ;;  %v340_v1 = vmax.f32 %v308_v54, %v324_v51  ;;  %v1598_v4 = vcombine.high %v449_v49, %v1840_v41 }
  0xb6   :  { %v619_v60 = vrot.slane %v598_v50, %v1805_v32  ;;  %v527_v7 = vrot.slane %v512_v58, %v1805_v32  ;;  %v729_v10 = vrot.slane %v713_v16, %v1805_v32  ;;  %v466_v13 = vcombine.high %v336_v2, %v336_v2 }
  0xb7   :  { %v810_v8 = vcombine.low %v534_v61, %v566_v17  ;;  %v622_v9 = vcombine.high %v340_v1, %v340_v1  ;;  %v629_v12 = vrot.slane %v340_v1, %v1805_v32  ;;  %v612_v53 = vrot.slane %v597_v57, %v1805_v32 }
  0xb8   :  { %v813_v5 = vcombine.low %v605_v59, %v619_v60  ;;  %v1600_v6 = vcombine.high %v605_v59, %v619_v60  ;;  %v763_v14 = vcombine.low %v527_v7, %v541_v0  ;;  %v473_v17 = vrot.slane %v336_v2, %v1805_v32 }
  0xb9   :  { %v820_v15 = vrot.slane %v810_v8, %v1805_v32  ;;  %v636_v18 = vrot.slane %v622_v9, %v1805_v32  ;;  %v637_v20 = vcombine.high %v629_v12, %v629_v12  ;;  %v644_v22 = vrot.slane %v629_v12, %v1805_v32 }
  0xba   :  { %v841_v11 = vrot.slane %v813_v5, %v1805_v32  ;;  %v869_v24 = vrot.slane %v1600_v6, %v1805_v32  ;;  %v1599_v25 = vcombine.high %v527_v7, %v541_v0  ;;  %v480_v26 = vrot.slane %v466_v13, %v1805_v32 }
  0xbb   :  { %v842_v34 = vcombine.low %v820_v15, %v827_v63  ;;  %v658_v27 = vrot.slane %v637_v20, %v1805_v32  ;;  %v659_v28 = vcombine.high %v644_v22, %v644_v22  ;;  %v860_v30 = vcombine.low %v612_v53, %v644_v22 }
  0xbc   :  { %v843_v19 = vcombine.low %v834_v3, %v841_v11  ;;  %v481_v31 = vcombine.high %v473_v17, %v473_v17  ;;  %v651_v33 = vrot.slane %v636_v18, %v1805_v32  ;;  %v488_v35 = vrot.slane %v473_v17, %v1805_v32 }
  0xbd   :  { %v850_v36 = vrot.slane %v842_v34, %v1805_v32  ;;  %v660_v38 = vcombine.high %v658_v27, %v658_v27  ;;  %v861_v48 = vcombine.low %v658_v27, %v659_v28  ;;  %v876_v39 = vrot.slane %v860_v30, %v1805_v32 }
  0xbe   :  { %v857_v37 = vrot.slane %v843_v19, %v1805_v32  ;;  %v502_v40 = vrot.slane %v481_v31, %v1805_v32  ;;  %v785_v41 = vrot.slane %v763_v14, %v1805_v32  ;;  %v503_v42 = vcombine.high %v488_v35, %v488_v35 }
  0xbf   :  { %v715_v43 = vcombine.low %v456_v23, %v488_v35  ;;  %v792_v45 = vrot.slane %v1599_v25, %v1805_v32  ;;  %v862_v58 = vcombine.low %v660_v38, %v651_v33  ;;  %v495_v46 = vrot.slane %v480_v26, %v1805_v32 }
  0xc0   :  { %v858_v44 = vcombine.low %v850_v36, %v857_v37  ;;  %v504_v47 = vcombine.high %v502_v40, %v502_v40  ;;  %v736_v49 = vrot.slane %v1598_v4, %v1805_v32  ;;  %v744_v50 = vcombine.low %v722_v62, %v729_v10 }
  0xc1   :  { %v743_v51 = vrot.slane %v715_v43, %v1805_v32  ;;  %v761_v52 = vcombine.low %v502_v40, %v503_v42  ;;  %v883_v63 = vrot.slane %v861_v48, %v1805_v32  ;;  %v890_v54 = vrot.slane %v862_v58, %v1805_v32 }
  0xc2   :  { %1632 = vmatmul.mubr.msk.f32.vlgmr.msra.gmra.mrb[0].mxu1 %vm908_vm8, %v858_v44  ;;  %v891_v55 = vcombine.low %v869_v24, %v876_v39  ;;  %v762_v56 = vcombine.low %v504_v47, %v495_v46  ;;  %v794_v57 = vcombine.low %v785_v41, %v792_v45  ;;  %v752_v60 = vrot.slane %v744_v50, %v1805_v32 }
  0xc3   :  { %1634 = vmatprep.mubr.msk.f32.mxu1 %vm1684_vm7, %v1685_v21  ;;  %v745_v16 = vcombine.low %v736_v49, %v743_v51  ;;  %v771_v59 = vrot.slane %v761_v52, %v1805_v32  ;;  %v892_v62 = vcombine.low %v883_v63, %v890_v54 }
  0xc4   :  { %v778_v29 = vrot.slane %v762_v56, %v1805_v32  ;;  %v899_v1 = vrot.slane %v891_v55, %v1805_v32  ;;  %v808_v4 = vrot.slane %v794_v57, %v1805_v32 }
  0xc5   :  { %v759_v61 = vrot.slane %v745_v16, %v1805_v32  ;;  %v906_v2 = vrot.slane %v892_v62, %v1805_v32 }
  0xc6   :  { %v793_v0 = vcombine.low %v771_v59, %v778_v29 }
  0xc7   :  { %v760_v3 = vcombine.low %v752_v60, %v759_v61  ;;  %v907_v5 = vcombine.low %v899_v1, %v906_v2 }
  0xc8   :  { %v801_v23 = vrot.slane %v793_v0, %v1805_v32 }
  0xc9   :  { %1626 = vmatmul.mubr.msk.f32.gmra.mrb[2].mxu0 %vm908_vm8, %v760_v3  ;;  %1635 = vmatmul.mubr.msk.f32.gmra.mrb[2].mxu1 %vm908_vm8, %v907_v5 }
  0xca   :  { %1628 = vmatprep.mubr.msk.f32.mxu0 %vm1684_vm7, %v1685_v21  ;;  %v809_v6 = vcombine.low %v801_v23, %v808_v4 }
  0xcd   :  { %1629 = vmatmul.mubr.msk.f32.gmra.mrb[4].mxu0 %vm908_vm8, %v809_v6 }
 0x180   :  { %v989_v7 = vpop.f32.mrb[0].mxu0 }
 0x181   :  { %v1018_v8 = vcombine.high %v989_v7, %v989_v7  ;;  %v1025_v9 = vrot.slane %v989_v7, %v1805_v32  ;;  %v1624_v10 = vpop.f32.mrb[1].mxu0 }
 0x183   :  { %v1032_v11 = vrot.slane %v1018_v8, %v1805_v32  ;;  %v1033_v12 = vcombine.high %v1025_v9, %v1025_v9  ;;  %v1041_v13 = vrot.slane %v1025_v9, %v1805_v32 }
 0x185   :  { %v1048_v53 = vrot.slane %v1032_v11, %v1805_v32  ;;  %v1055_v14 = vrot.slane %v1033_v12, %v1805_v32  ;;  %v1034_v26 = vcombine.high %v1032_v11, %v1032_v11 }
 0x187   :  { %v1263_v21 = vcombine.low %v1041_v13, %v1055_v14  ;;  %v1607_v15 = vcombine.high %v1041_v13, %v1055_v14  ;;  %v1285_v20 = vrot.slane %v1048_v53, %v1805_v32  ;;  %v1062_v27 = vrot.slane %v1034_v26, %v1805_v32 }
 0x188   :  { %v1064_v28 = vcombine.high %v1048_v53, %v1048_v53 }
 0x189   :  { %v1271_v18 = vrot.slane %v1263_v21, %v1805_v32  ;;  %v1278_v19 = vrot.slane %v1607_v15, %v1805_v32  ;;  %v1300_v24 = vrot.slane %v1285_v20, %v1805_v32  ;;  %v1066_v58 = vcombine.high %v1062_v27, %v1062_v27 }
 0x18a   :  { %v1302_v38 = vcombine.low %v1062_v27, %v1064_v28 }
 0x18b   :  { %v1286_v22 = vcombine.low %v1271_v18, %v1278_v19 }
 0x18c   :  { %v1310_v50 = vrot.slane %v1302_v38, %v1805_v32 }
 0x18d   :  { %v1293_v17 = vrot.slane %v1286_v22, %v1805_v32 }
 0x18f   :  { %v1301_v25 = vcombine.low %v1293_v17, %v1300_v24 }
 0x191   :  { %1584 = vst.msk [vmem:[%s2033_s2] sm:$0x1f] %vm1583_vm9, %v1301_v25 }
 0x195   :  { %v1004_v34 = vpop.f32.mrb[0].mxu1 }
 0x196   :  { %v1165_v30 = vcombine.high %v1004_v34, %v1004_v34  ;;  %v1172_v31 = vrot.slane %v1004_v34, %v1805_v32  ;;  %v1633_v33 = vpop.f32.mrb[1].mxu1 }
 0x198   :  { %v1179_v35 = vrot.slane %v1165_v30, %v1805_v32  ;;  %v1180_v36 = vcombine.high %v1172_v31, %v1172_v31  ;;  %v1923_v37 = vrot.slane %v1172_v31, %v1805_v32 }
 0x19a   :  { %v1181_v48 = vcombine.high %v1179_v35, %v1179_v35  ;;  %v1202_v39 = vrot.slane %v1180_v36, %v1805_v32  ;;  %v1210_v40 = vcombine.high %v1923_v37, %v1923_v37  ;;  %v1929_v41 = vrot.slane %v1179_v35, %v1805_v32 }
 0x19b   :  { %v1441_v46 = vrot.slane %v1923_v37, %v1805_v32 }
 0x19c   :  { %v1932_v42 = vrot.slane %v1181_v48, %v1805_v32  ;;  %v1212_v43 = vcombine.high %v1202_v39, %v1202_v39  ;;  %v1458_v44 = vcombine.low %v1202_v39, %v1210_v40  ;;  %v994_v45 = vpop.f32.mrb[2].mxu0  ;;  %v1009_v52 = vpop.f32.mrb[2].mxu1 }
 0x19d   :  { %v1627_v51 = vpop.f32.mrb[3].mxu0  ;;  %v1067_v63 = vcombine.high %v994_v45, %v994_v45  ;;  %v1074_v54 = vrot.slane %v994_v45, %v1805_v32  ;;  %v1214_v55 = vcombine.high %v1009_v52, %v1009_v52  ;;  %v1942_v56 = vrot.slane %v1009_v52, %v1805_v32  ;;  %v1636_v16 = vpop.f32.mrb[3].mxu1 }
 0x19e   :  { %v1459_v47 = vcombine.low %v1212_v43, %v1929_v41  ;;  %v1480_v49 = vrot.slane %v1932_v42, %v1805_v32  ;;  %v1466_v57 = vrot.slane %v1458_v44, %v1805_v32  ;;  %v1610_v62 = vcombine.high %v1929_v41, %v1932_v42 }
 0x19f   :  { %v1081_v60 = vrot.slane %v1067_v63, %v1805_v32  ;;  %v1082_v61 = vcombine.high %v1074_v54, %v1074_v54  ;;  %v1090_v0 = vrot.slane %v1074_v54, %v1805_v32  ;;  %v1228_v2 = vrot.slane %v1214_v55, %v1805_v32 }
 0x1a0   :  { %v1473_v59 = vrot.slane %v1459_v47, %v1805_v32  ;;  %v1495_v29 = vrot.slane %v1480_v49, %v1805_v32  ;;  %v999_v1 = vpop.f32.mrb[4].mxu0  ;;  %v1229_v5 = vcombine.high %v1942_v56, %v1942_v56  ;;  %v1237_v55 = vrot.slane %v1942_v56, %v1805_v32 }
 0x1a1   :  { %v1116_v23 = vcombine.high %v999_v1, %v999_v1  ;;  %v1123_v4 = vrot.slane %v999_v1, %v1805_v32  ;;  %v1630_v6 = vpop.f32.mrb[5].mxu0  ;;  %v1083_v7 = vcombine.high %v1081_v60, %v1081_v60  ;;  %v1097_v8 = vrot.slane %v1081_v60, %v1805_v32 }
 0x1a2   :  { %v1481_v3 = vcombine.low %v1466_v57, %v1473_v59  ;;  %v1104_v9 = vrot.slane %v1082_v61, %v1805_v32  ;;  %v1303_v10 = vcombine.low %v1066_v58, %v1090_v0  ;;  %v1230_v47 = vcombine.high %v1228_v2, %v1228_v2 }
 0x1a3   :  { %v1130_v12 = vrot.slane %v1116_v23, %v1805_v32  ;;  %v1131_v13 = vcombine.high %v1123_v4, %v1123_v4  ;;  %v1139_v53 = vrot.slane %v1123_v4, %v1805_v32  ;;  %v1111_v14 = vrot.slane %v1083_v7, %v1805_v32 }
 0x1a4   :  { %v1488_v11 = vrot.slane %v1481_v3, %v1805_v32  ;;  %v1113_v21 = vcombine.high %v1097_v8, %v1097_v8  ;;  %v1317_v15 = vrot.slane %v1303_v10, %v1805_v32  ;;  %v1324_v18 = vrot.slane %v1104_v9, %v1805_v32 }
 0x1a5   :  { %v1608_v20 = vcombine.high %v1090_v0, %v1104_v9  ;;  %v1132_v22 = vcombine.high %v1130_v12, %v1130_v12  ;;  %v1146_v17 = vrot.slane %v1130_v12, %v1805_v32  ;;  %v1342_v26 = vcombine.low %v1097_v8, %v1111_v14 }
 0x1a6   :  { %v1496_v19 = vcombine.low %v1488_v11, %v1495_v29  ;;  %v1325_v24 = vcombine.low %v1310_v50, %v1317_v15  ;;  %v1339_v25 = vrot.slane %v1324_v18, %v1805_v32  ;;  %v1363_v34 = vrot.slane %v1113_v21, %v1805_v32 }
 0x1a7   :  { %v1349_v27 = vrot.slane %v1608_v20, %v1805_v32  ;;  %v1115_v28 = vcombine.high %v1111_v14, %v1111_v14  ;;  %v1153_v30 = vrot.slane %v1131_v13, %v1805_v32  ;;  %v1160_v31 = vrot.slane %v1132_v22, %v1805_v32 }
 0x1a8   :  { %1589 = vst.msk [vmem:[%s2033_s2 + $0x28] sm:$0x1f] %vm1583_vm9, %v1496_v19  ;;  %v1332_v33 = vrot.slane %v1325_v24, %v1805_v32  ;;  %v1356_v35 = vrot.slane %v1342_v26, %v1805_v32  ;;  %v1378_v36 = vrot.slane %v1363_v34, %v1805_v32  ;;  %v1161_v38 = vcombine.high %v1139_v53, %v1139_v53 }
 0x1a9   :  { %v1163_v48 = vcombine.high %v1153_v30, %v1153_v30  ;;  %v1380_v39 = vcombine.low %v1115_v28, %v1139_v53  ;;  %v1419_v40 = vcombine.low %v1146_v17, %v1160_v31  ;;  %v1609_v43 = vcombine.high %v1146_v17, %v1160_v31 }
 0x1aa   :  { %v1340_v44 = vcombine.low %v1332_v33, %v1339_v25  ;;  %v1364_v45 = vcombine.low %v1349_v27, %v1356_v35  ;;  %v1381_v58 = vcombine.low %v1153_v30, %v1161_v38  ;;  %v1244_v16 = vrot.slane %v1228_v2, %v1805_v32 }
 0x1ab   :  { %v1388_v49 = vrot.slane %v1380_v39, %v1805_v32  ;;  %v1402_v50 = vrot.slane %v1163_v48, %v1805_v32  ;;  %v1427_v51 = vrot.slane %v1419_v40, %v1805_v32  ;;  %v1434_v52 = vrot.slane %v1609_v43, %v1805_v32 }
 0x1ac   :  { %v1371_v63 = vrot.slane %v1364_v45, %v1805_v32  ;;  %1585 = vst.msk [vmem:[%s2033_s2 + $0x8] sm:$0x1f] %vm1583_vm9, %v1340_v44  ;;  %v1395_v54 = vrot.slane %v1381_v58, %v1805_v32  ;;  %v1456_v57 = vrot.slane %v1441_v46, %v1805_v32  ;;  %v1251_v29 = vrot.slane %v1229_v5, %v1805_v32 }
 0x1ad   :  { %v1442_v59 = vcombine.low %v1427_v51, %v1434_v52  ;;  %v1258_v60 = vrot.slane %v1230_v47, %v1805_v32  ;;  %v1259_v1 = vcombine.high %v1237_v55, %v1237_v55  ;;  %v1260_v3 = vcombine.high %v1244_v16, %v1244_v16 }
 0x1ae   :  { %v1379_v61 = vcombine.low %v1371_v63, %v1378_v36  ;;  %v1403_v0 = vcombine.low %v1388_v49, %v1395_v54  ;;  %v1261_v4 = vcombine.high %v1251_v29, %v1251_v29  ;;  %v1498_v6 = vcombine.low %v1237_v55, %v1251_v29 }
 0x1af   :  { %v1449_v23 = vrot.slane %v1442_v59, %v1805_v32  ;;  %v1262_v56 = vcombine.high %v1258_v60, %v1258_v60  ;;  %v1505_v37 = vrot.slane %v1610_v62, %v1805_v32  ;;  %v1417_v2 = vrot.slane %v1402_v50, %v1805_v32 }
 0x1b0   :  { %1586 = vst.msk [vmem:[%s2033_s2 + $0x10] sm:$0x1f] %vm1583_vm9, %v1379_v61  ;;  %v1410_v46 = vrot.slane %v1403_v0, %v1805_v32  ;;  %v1537_v5 = vcombine.low %v1258_v60, %v1260_v3  ;;  %v1512_v8 = vrot.slane %v1498_v6, %v1805_v32  ;;  %v1519_v9 = vrot.slane %v1259_v1, %v1805_v32 }
 0x1b1   :  { %v1457_v7 = vcombine.low %v1449_v23, %v1456_v57  ;;  %v1536_v10 = vcombine.low %v1261_v4, %v1244_v16  ;;  %v1558_v12 = vrot.slane %v1262_v56, %v1805_v32 }
 0x1b2   :  { %v1418_v11 = vcombine.low %v1410_v46, %v1417_v2  ;;  %v1551_v41 = vrot.slane %v1537_v5, %v1805_v32  ;;  %v1520_v42 = vcombine.low %v1505_v37, %v1512_v8  ;;  %v1534_v53 = vrot.slane %v1519_v9, %v1805_v32 }
 0x1b3   :  { %1588 = vst.msk [vmem:[%s2033_s2 + $0x20] sm:$0x1f] %vm1583_vm9, %v1457_v7  ;;  %v1544_v62 = vrot.slane %v1536_v10, %v1805_v32  ;;  %v1573_v18 = vrot.slane %v1558_v12, %v1805_v32 }
 0x1b4   :  { %1587 = vst.msk [vmem:[%s2033_s2 + $0x18] sm:$0x1f] %vm1583_vm9, %v1418_v11  ;;  %v1527_v13 = vrot.slane %v1520_v42, %v1805_v32 }
 0x1b5   :  { %v1559_v14 = vcombine.low %v1544_v62, %v1551_v41 }
 0x1b6   :  { %v1535_v21 = vcombine.low %v1527_v13, %v1534_v53 }
 0x1b7   :  { %v1566_v15 = vrot.slane %v1559_v14, %v1805_v32 }
 0x1b8   :  { %1590 = vst.msk [vmem:[%s2033_s2 + $0x30] sm:$0x1f] %vm1583_vm9, %v1535_v21 }
 0x1b9   :  { %v1574_v19 = vcombine.low %v1566_v15, %v1573_v18 }
 0x1bb   :  { %1591 = vst.msk [vmem:[%s2033_s2 + $0x38] sm:$0x1f] %vm1583_vm9, %v1574_v19 }
 0x1bc   :  { %1596 = vsyncpa [#allocation3], 1 }

</bundles_post_ra>
